<compile_context>
chip_gen: v7x
topology: tpu7x:2x2x1
jax: 0.10.0
libtpu: 0.0.40
codegen_flags: <defaults>
</compile_context>

<pallas_src>
import functools

import jax
import jax.numpy as jnp
from jax.experimental import pallas as pl
from jax.experimental.pallas import tpu as pltpu


def _round_up(x, m):
    return ((x + m - 1) // m) * m


def _cdiv(a, b):
    return -(-a // b)


def _vmem_capacity_bytes():
    try:
        info = pltpu.get_tpu_info()
        cap = getattr(info, "vmem_capacity_bytes", None)
        if cap:
            return int(cap)
    except Exception:
        pass
    return 64 * 2**20  # conservative fallback (v7x per-TensorCore VMEM)


def _est_vmem_bytes(blk, Dp, act_isz, w_isz, aggregation, normalize, fuse_concat,
                    weight_buffers=1):
    """Rough per-kernel VMEM footprint (activations double-buffered)."""
    act = 3 * 2 * blk * Dp * act_isz                      # x1, x2, out streams
    k1 = 2 * Dp if aggregation == 'concat' else Dp
    wbytes = weight_buffers * (k1 * Dp + Dp * Dp) * w_isz  # W1 + W2
    bbytes = weight_buffers * 2 * 8 * Dp * w_isz           # (1,D) biases, 8-sublane pad
    f32tmp = 2 * blk * Dp * 4                               # h + y f32 intermediates
    if normalize:
        f32tmp += 2 * blk * Dp * 4                           # f32 copies of x1/x2
    if aggregation == 'concat' and fuse_concat:
        f32tmp += blk * 2 * Dp * act_isz                     # [x1|x2] staging copy
    return act + wbytes + bbytes + f32tmp


def _l2_normalize(x):
    # F.normalize(x, dim=-1): x / max(||x||_2, 1e-12) == x * rsqrt(max(ss, 1e-24))
    xf = x.astype(jnp.float32)
    ss = jnp.sum(xf * xf, axis=-1, keepdims=True)
    inv = jax.lax.rsqrt(jnp.maximum(ss, 1e-24))          # EUP slot, ~free
    return (xf * inv).astype(x.dtype)


def _aggregator_kernel(x1_ref, x2_ref, w1_ref, b1_ref, w2_ref, b2_ref, o_ref, *,
                       aggregation, normalize, fuse_concat):
    x1 = x1_ref[...]
    x2 = x2_ref[...]
    if normalize:
        x1 = _l2_normalize(x1)
        x2 = _l2_normalize(x2)

    if aggregation == 'concat':
        if fuse_concat:
            # One K=2D MXU push (fills the 256-deep MXU on v6e/v7x when D=128)
            # and removes the f32 partial-sum add.
            x = jnp.concatenate([x1, x2], axis=-1)
            h = jnp.dot(x, w1_ref[...], preferred_element_type=jnp.float32)
        else:
            D = x1.shape[-1]
            h = (jnp.dot(x1, w1_ref[:D, :], preferred_element_type=jnp.float32)
                 + jnp.dot(x2, w1_ref[D:, :], preferred_element_type=jnp.float32))
    elif aggregation == 'dot':
        h = jnp.dot(x1 * x2, w1_ref[...], preferred_element_type=jnp.float32)
    elif aggregation == 'sum':
        h = jnp.dot(x1 + x2, w1_ref[...], preferred_element_type=jnp.float32)
    else:
        raise ValueError(aggregation)

    h = jnp.maximum(h + b1_ref[...].astype(jnp.float32), 0.0)   # bias + ReLU (f32)
    # Second matmul: keep f32 if either the activations or W2 are f32; only a
    # fully-bf16 problem takes the bf16 MXU fast path.
    h_dtype = jnp.promote_types(x1_ref.dtype, w2_ref.dtype)
    y = (jnp.dot(h.astype(h_dtype), w2_ref[...], preferred_element_type=jnp.float32)
         + b2_ref[...].astype(jnp.float32))
    o_ref[...] = y.astype(o_ref.dtype)


def aggregator_forward(x1, x2, params, *, aggregation='concat', normalize=False,
                       block_b=None):
    """Fused Aggregator MLP as a single Pallas kernel, pipelined over the batch.

    params (weights stored (in, out), biases (D,)):
      concat   : (w1, b1, w2, b2) with w1 of shape (2D, D),
                 or (w1a, w1b, b1, w2, b2) with w1a/w1b = W1[:D], W1[D:]
      dot/sum  : (w1, b1, w2, b2) with w1 of shape (D, D)
                 (a 5-tuple with a dummy second weight is tolerated)
    """
    assert x1.shape == x2.shape and x1.ndim == 2
    B, D = x1.shape

    # --- Normalize params to (w1, b1, w2, b2).
    if aggregation == 'concat':
        if len(params) == 5:
            w1a, w1b, b1, w2, b2 = params
            w1 = jnp.concatenate([w1a, w1b], axis=0)
        else:
            w1, b1, w2, b2 = params
        assert w1.shape == (2 * D, D)
    else:
        if len(params) == 5:          # tolerate old-style 5-tuple; 2nd slot unused
            w1, _, b1, w2, b2 = params
        else:
            w1, b1, w2, b2 = params
        assert w1.shape == (D, D)
    assert w2.shape == (D, D)

    # --- Pad the feature dim to a multiple of 128: lane-dense stores are the
    # single biggest wall-clock lever; padding is pure layout plumbing.
    Dp = _round_up(D, 128)
    pad = Dp - D
    if pad:
        x1 = jnp.pad(x1, ((0, 0), (0, pad)))
        x2 = jnp.pad(x2, ((0, 0), (0, pad)))
        if aggregation == 'concat':
            w1a = jnp.pad(w1[:D], ((0, pad), (0, pad)))
            w1b = jnp.pad(w1[D:], ((0, pad), (0, pad)))
            w1 = jnp.concatenate([w1a, w1b], axis=0)
        else:
            w1 = jnp.pad(w1, ((0, pad), (0, pad)))
        w2 = jnp.pad(w2, ((0, pad), (0, pad)))
        b1 = jnp.pad(b1, ((0, pad),))
        b2 = jnp.pad(b2, ((0, pad),))
    b1 = b1.reshape(1, Dp)
    b2 = b2.reshape(1, Dp)

    fuse_concat = (aggregation == 'concat' and Dp <= 128)

    act_isz = jnp.dtype(x1.dtype).itemsize
    w_isz = jnp.dtype(w1.dtype).itemsize

    vmem_budget = int(0.75 * _vmem_capacity_bytes())   # headroom for Mosaic scratch

    # --- Batch tile: target ~2 MiB per activation stream per grid step so the
    # per-step pipeline overhead is amortized (kernel is HBM-bound for real D).
    if block_b is None:
        if B <= 8:
            block_b = B
        else:
            tgt = (2 << 20) // max(1, Dp * act_isz)
            block_b = _round_up(max(8, tgt), 8)
            block_b = min(block_b, _round_up(_cdiv(B, 2), 8))   # keep >= 2 steps
            block_b = min(block_b, _round_up(B, 8))
            # Prefer an even step count (balances v7x's two TensorCores).
            steps = _cdiv(B, block_b)
            if steps > 1 and steps % 2 == 1:
                cand = _round_up(_cdiv(B, steps + 1), 8)
                if cand >= 8 and _cdiv(B, cand) % 2 == 0:
                    block_b = cand
    block_b = max(1, min(block_b, _round_up(B, 8) if B >= 8 else B))

    # Shrink the tile until the estimated footprint fits the VMEM budget.
    while (block_b > 8 and
           _est_vmem_bytes(block_b, Dp, act_isz, w_isz, aggregation, normalize,
                           fuse_concat) > vmem_budget):
        block_b = max(8, _round_up(block_b // 2, 8))
    # TODO(synk): for very large D (weight bytes approaching the VMEM budget) add
    # an output-feature grid axis (tile W1/W2 along N) instead of shrinking block_b.

    est_vmem = _est_vmem_bytes(block_b, Dp, act_isz, w_isz, aggregation,
                               normalize, fuse_concat)
    vmem_limit = int(min(vmem_budget, max(est_vmem + (6 << 20), 20 << 20)))

    grid = (_cdiv(B, block_b),)     # ragged last block is masked by Pallas

    kernel = functools.partial(_aggregator_kernel, aggregation=aggregation,
                               normalize=normalize, fuse_concat=fuse_concat)

    k1 = 2 * Dp if aggregation == 'concat' else Dp
    cost = pl.CostEstimate(
        flops=2 * B * Dp * (k1 + Dp),
        transcendentals=(2 * B if normalize else 0),
        bytes_accessed=(3 * B * Dp * act_isz + (k1 * Dp + Dp * Dp + 2 * Dp) * w_isz))

    x_spec = pl.BlockSpec((block_b, Dp), lambda i: (i, 0))

    def _build(single_buffer_weights):
        kw = dict(pipeline_mode=pl.Buffered(1)) if single_buffer_weights else {}
        w1_spec = pl.BlockSpec((k1, Dp), lambda i: (0, 0), **kw)
        w2_spec = pl.BlockSpec((Dp, Dp), lambda i: (0, 0), **kw)
        b_spec = pl.BlockSpec((1, Dp), lambda i: (0, 0), **kw)
        return pl.pallas_call(
            kernel,
            out_shape=jax.ShapeDtypeStruct((B, Dp), x1.dtype),
            grid_spec=pltpu.PrefetchScalarGridSpec(
                num_scalar_prefetch=0,
                grid=grid,
                in_specs=[x_spec, x_spec, w1_spec, b_spec, w2_spec, b_spec],
                out_specs=x_spec,
            ),
            compiler_params=pltpu.CompilerParams(
                dimension_semantics=("parallel",),
                vmem_limit_bytes=vmem_limit),
            cost_estimate=cost,
        )

    args = (x1, x2, w1, b1, w2, b2)
    try:
        out = _build(True)(*args)      # single-buffered grid-invariant weights
    except Exception:
        out = _build(False)(*args)     # fallback: default double-buffering

    if pad:
        out = out[:, :D]
    return out


def reference_forward(x1, x2, params, *, aggregation='concat', normalize=False):
    if aggregation == 'concat':
        if len(params) == 5:
            w1a, w1b, b1, w2, b2 = params
            w1 = jnp.concatenate([w1a, w1b], axis=0)
        else:
            w1, b1, w2, b2 = params
    else:
        if len(params) == 5:
            w1, _, b1, w2, b2 = params
        else:
            w1, b1, w2, b2 = params
    x1 = x1.astype(jnp.float32)
    x2 = x2.astype(jnp.float32)
    if normalize:
        x1 = x1 / jnp.maximum(jnp.linalg.norm(x1, axis=-1, keepdims=True), 1e-12)
        x2 = x2 / jnp.maximum(jnp.linalg.norm(x2, axis=-1, keepdims=True), 1e-12)
    if aggregation == 'concat':
        x = jnp.concatenate([x1, x2], axis=-1)
    elif aggregation == 'dot':
        x = x1 * x2
    else:
        x = x1 + x2
    h = jax.nn.relu(x @ w1.astype(jnp.float32) + b1.astype(jnp.float32))
    return h @ w2.astype(jnp.float32) + b2.astype(jnp.float32)


if __name__ == "__main__":
    # Small, TPU-friendly shapes: embed_dim=128, batch=16 (-> 2 grid steps).
    B, D = 16, 128
    key = jax.random.PRNGKey(0)
    k_x1, k_x2, k_w1, k_b1, k_w2, k_b2 = jax.random.split(key, 6)

    x1 = jax.random.normal(k_x1, (B, D), dtype=jnp.float32)
    x2 = jax.random.normal(k_x2, (B, D), dtype=jnp.float32)

    # Synthetic PyTorch-style params: Linear(2D, D) then Linear(D, D), stored (in, out).
    w1 = jax.random.normal(k_w1, (2 * D, D), dtype=jnp.float32) * 0.02
    b1 = jax.random.normal(k_b1, (D,), dtype=jnp.float32) * 0.02
    w2 = jax.random.normal(k_w2, (D, D), dtype=jnp.float32) * 0.02
    b2 = jax.random.normal(k_b2, (D,), dtype=jnp.float32) * 0.02
    params = (w1, b1, w2, b2)

    # 1) concat, f32 (fused K=2D path)
    out = aggregator_forward(x1, x2, params, aggregation='concat', normalize=False)
    out = jax.block_until_ready(out)
    ref = reference_forward(x1, x2, params, aggregation='concat', normalize=False)
    assert out.shape == (B, D)
    assert jnp.allclose(out, ref, atol=1e-4, rtol=1e-4)

    # 2) concat, bf16 activations + weights (native bf16 into the MXU)
    x1_bf, x2_bf = x1.astype(jnp.bfloat16), x2.astype(jnp.bfloat16)
    params_bf = tuple(p.astype(jnp.bfloat16) for p in params)
    out_bf = aggregator_forward(x1_bf, x2_bf, params_bf, aggregation='concat')
    out_bf = jax.block_until_ready(out_bf)
    assert out_bf.dtype == jnp.bfloat16
    ref_bf = reference_forward(x1_bf, x2_bf, params_bf, aggregation='concat')
    assert jnp.allclose(out_bf.astype(jnp.float32), ref_bf, atol=2e-2, rtol=2e-2)

    # 3) sum + normalize, ragged batch (B=20 not a multiple of the tile)
    Br = 20
    x1r = jax.random.normal(jax.random.PRNGKey(1), (Br, D), dtype=jnp.float32)
    x2r = jax.random.normal(jax.random.PRNGKey(2), (Br, D), dtype=jnp.float32)
    params_sum = (w2, b1, w1[:D], b2)   # (D,D) first weight for 'sum'
    out_r = aggregator_forward(x1r, x2r, params_sum, aggregation='sum', normalize=True)
    out_r = jax.block_until_ready(out_r)
    ref_r = reference_forward(x1r, x2r, params_sum, aggregation='sum', normalize=True)
    assert out_r.shape == (Br, D)
    assert jnp.allclose(out_r, ref_r, atol=1e-4, rtol=1e-4)

    # 4) dot, D=64 (exercises the lane-padding path: D padded to 128, sliced back)
    Bd, Dd = 12, 64
    kx, kw = jax.random.split(jax.random.PRNGKey(3))
    x1d = jax.random.normal(kx, (Bd, Dd), dtype=jnp.float32)
    x2d = jax.random.normal(kw, (Bd, Dd), dtype=jnp.float32)
    w1d = jax.random.normal(jax.random.PRNGKey(4), (Dd, Dd), dtype=jnp.float32) * 0.05
    w2d = jax.random.normal(jax.random.PRNGKey(5), (Dd, Dd), dtype=jnp.float32) * 0.05
    b1d = jax.random.normal(jax.random.PRNGKey(6), (Dd,), dtype=jnp.float32) * 0.05
    b2d = jax.random.normal(jax.random.PRNGKey(7), (Dd,), dtype=jnp.float32) * 0.05
    params_dot = (w1d, b1d, w2d, b2d)
    out_d = aggregator_forward(x1d, x2d, params_dot, aggregation='dot')
    out_d = jax.block_until_ready(out_d)
    ref_d = reference_forward(x1d, x2d, params_dot, aggregation='dot')
    assert out_d.shape == (Bd, Dd)
    assert jnp.allclose(out_d, ref_d, atol=1e-4, rtol=1e-4)

    print("KERNEL_OK")
</pallas_src>

<mosaic_0001>
module attributes {stable_mosaic.version = 11 : i64} {
  func.func @_aggregator_kernel(%arg0: i32, %arg1: memref<8x128xf32, #tpu.memory_space<vmem>>, %arg2: memref<8x128xf32, #tpu.memory_space<vmem>>, %arg3: memref<256x128xf32, #tpu.memory_space<vmem>>, %arg4: memref<1x128xf32, #tpu.memory_space<vmem>>, %arg5: memref<128x128xf32, #tpu.memory_space<vmem>>, %arg6: memref<1x128xf32, #tpu.memory_space<vmem>>, %arg7: memref<8x128xf32, #tpu.memory_space<vmem>>) attributes {dimension_semantics = [#tpu.dimension_semantics<parallel>], iteration_bounds = array<i64: 2>, scalar_prefetch = 0 : i64, scratch_operands = 0 : i64, tpu.core_type = #tpu.core_type<tc>, window_params = [{transform_indices = @transform_0, window_bounds = array<i64: 8, 128>}, {transform_indices = @transform_1, window_bounds = array<i64: 8, 128>}, {pipeline_mode = #tpu.pipeline_mode<synchronous>, transform_indices = @transform_2, window_bounds = array<i64: 256, 128>}, {pipeline_mode = #tpu.pipeline_mode<synchronous>, transform_indices = @transform_3, window_bounds = array<i64: 1, 128>}, {pipeline_mode = #tpu.pipeline_mode<synchronous>, transform_indices = @transform_4, window_bounds = array<i64: 128, 128>}, {pipeline_mode = #tpu.pipeline_mode<synchronous>, transform_indices = @transform_5, window_bounds = array<i64: 1, 128>}, {transform_indices = @transform_6, window_bounds = array<i64: 8, 128>}]} {
    %c0 = arith.constant 0 : index
    %c0_0 = arith.constant 0 : index
    %0 = vector.load %arg1[%c0, %c0_0] : memref<8x128xf32, #tpu.memory_space<vmem>>, vector<8x128xf32>
    %c0_1 = arith.constant 0 : index
    %c0_2 = arith.constant 0 : index
    %1 = vector.load %arg2[%c0_1, %c0_2] : memref<8x128xf32, #tpu.memory_space<vmem>>, vector<8x128xf32>
    %2 = tpu.concatenate %0, %1 in 1 : vector<8x128xf32>, vector<8x128xf32> -> vector<8x256xf32>
    %c0_3 = arith.constant 0 : index
    %c0_4 = arith.constant 0 : index
    %3 = vector.load %arg3[%c0_3, %c0_4] : memref<256x128xf32, #tpu.memory_space<vmem>>, vector<256x128xf32>
    %cst = arith.constant dense<0.000000e+00> : vector<8x128xf32>
    %4 = tpu.matmul %2, %3, %cst {dimension_numbers = #tpu.dot_dimension_numbers<[1], [0], [0], [1], [0, 0, 1, 1], [], []>} : vector<8x256xf32>, vector<256x128xf32>, vector<8x128xf32> -> vector<8x128xf32>
    %c0_5 = arith.constant 0 : index
    %c0_6 = arith.constant 0 : index
    %5 = vector.load %arg4[%c0_5, %c0_6] : memref<1x128xf32, #tpu.memory_space<vmem>>, vector<1x128xf32>
    %6 = vector.broadcast %5 : vector<1x128xf32> to vector<8x128xf32>
    %7 = arith.addf %4, %6 : vector<8x128xf32>
    %cst_7 = arith.constant 0.000000e+00 : f32
    %8 = vector.broadcast %cst_7 : f32 to vector<8x128xf32>
    %9 = arith.maximumf %7, %8 : vector<8x128xf32>
    %c0_8 = arith.constant 0 : index
    %c0_9 = arith.constant 0 : index
    %10 = vector.load %arg5[%c0_8, %c0_9] : memref<128x128xf32, #tpu.memory_space<vmem>>, vector<128x128xf32>
    %cst_10 = arith.constant dense<0.000000e+00> : vector<8x128xf32>
    %11 = tpu.matmul %9, %10, %cst_10 {dimension_numbers = #tpu.dot_dimension_numbers<[1], [0], [0], [1], [0, 0, 1, 1], [], []>} : vector<8x128xf32>, vector<128x128xf32>, vector<8x128xf32> -> vector<8x128xf32>
    %c0_11 = arith.constant 0 : index
    %c0_12 = arith.constant 0 : index
    %12 = vector.load %arg6[%c0_11, %c0_12] : memref<1x128xf32, #tpu.memory_space<vmem>>, vector<1x128xf32>
    %13 = vector.broadcast %12 : vector<1x128xf32> to vector<8x128xf32>
    %14 = arith.addf %11, %13 : vector<8x128xf32>
    %c0_13 = arith.constant 0 : index
    %c0_14 = arith.constant 0 : index
    %15 = vector.load %arg7[%c0_13, %c0_14] : memref<8x128xf32, #tpu.memory_space<vmem>>, vector<8x128xf32>
    tpu.vector_store %arg7[%c0_13, %c0_14], %14 {strides = array<i32>} : memref<8x128xf32, #tpu.memory_space<vmem>>, vector<8x128xf32>,
    return
  }
  func.func @transform_0(%arg0: i32) -> (i32, i32) {
    %c0_i32 = arith.constant 0 : i32
    %c0_i32_0 = arith.constant 0 : i32
    return %arg0, %c0_i32 : i32, i32
  }
  func.func @transform_1(%arg0: i32) -> (i32, i32) {
    %c0_i32 = arith.constant 0 : i32
    %c0_i32_0 = arith.constant 0 : i32
    return %arg0, %c0_i32 : i32, i32
  }
  func.func @transform_2(%arg0: i32) -> (i32, i32) {
    %c0_i32 = arith.constant 0 : i32
    %c0_i32_0 = arith.constant 0 : i32
    %c0_i32_1 = arith.constant 0 : i32
    return %c0_i32, %c0_i32_0 : i32, i32
  }
  func.func @transform_3(%arg0: i32) -> (i32, i32) {
    %c0_i32 = arith.constant 0 : i32
    %c0_i32_0 = arith.constant 0 : i32
    %c0_i32_1 = arith.constant 0 : i32
    return %c0_i32, %c0_i32_0 : i32, i32
  }
  func.func @transform_4(%arg0: i32) -> (i32, i32) {
    %c0_i32 = arith.constant 0 : i32
    %c0_i32_0 = arith.constant 0 : i32
    %c0_i32_1 = arith.constant 0 : i32
    return %c0_i32, %c0_i32_0 : i32, i32
  }
  func.func @transform_5(%arg0: i32) -> (i32, i32) {
    %c0_i32 = arith.constant 0 : i32
    %c0_i32_0 = arith.constant 0 : i32
    %c0_i32_1 = arith.constant 0 : i32
    return %c0_i32, %c0_i32_0 : i32, i32
  }
  func.func @transform_6(%arg0: i32) -> (i32, i32) {
    %c0_i32 = arith.constant 0 : i32
    %c0_i32_0 = arith.constant 0 : i32
    return %arg0, %c0_i32 : i32, i32
  }
}

module attributes {stable_mosaic.version = 11 : i64} {
  func.func @_aggregator_kernel(%arg0: i32, %arg1: memref<8x128xf32, #tpu.memory_space<vmem>>, %arg2: memref<8x128xf32, #tpu.memory_space<vmem>>, %arg3: memref<256x128xf32, #tpu.memory_space<vmem>>, %arg4: memref<1x128xf32, #tpu.memory_space<vmem>>, %arg5: memref<128x128xf32, #tpu.memory_space<vmem>>, %arg6: memref<1x128xf32, #tpu.memory_space<vmem>>, %arg7: memref<8x128xf32, #tpu.memory_space<vmem>>) attributes {dimension_semantics = [#tpu.dimension_semantics<parallel>], iteration_bounds = array<i64: 2>, scalar_prefetch = 0 : i64, scratch_operands = 0 : i64, tpu.core_type = #tpu.core_type<tc>, window_params = [{transform_indices = @transform_0, window_bounds = array<i64: 8, 128>}, {transform_indices = @transform_1, window_bounds = array<i64: 8, 128>}, {pipeline_mode = #tpu.pipeline_mode<synchronous>, transform_indices = @transform_2, window_bounds = array<i64: 256, 128>}, {pipeline_mode = #tpu.pipeline_mode<synchronous>, transform_indices = @transform_3, window_bounds = array<i64: 1, 128>}, {pipeline_mode = #tpu.pipeline_mode<synchronous>, transform_indices = @transform_4, window_bounds = array<i64: 128, 128>}, {pipeline_mode = #tpu.pipeline_mode<synchronous>, transform_indices = @transform_5, window_bounds = array<i64: 1, 128>}, {transform_indices = @transform_6, window_bounds = array<i64: 8, 128>}]} {
    %c0 = arith.constant 0 : index
    %c0_0 = arith.constant 0 : index
    %0 = vector.load %arg1[%c0, %c0_0] : memref<8x128xf32, #tpu.memory_space<vmem>>, vector<8x128xf32>
    %c0_1 = arith.constant 0 : index
    %c0_2 = arith.constant 0 : index
    %1 = vector.load %arg2[%c0_1, %c0_2] : memref<8x128xf32, #tpu.memory_space<vmem>>, vector<8x128xf32>
    %2 = tpu.concatenate %0, %1 in 1 : vector<8x128xf32>, vector<8x128xf32> -> vector<8x256xf32>
    %c0_3 = arith.constant 0 : index
    %c0_4 = arith.constant 0 : index
    %3 = vector.load %arg3[%c0_3, %c0_4] : memref<256x128xf32, #tpu.memory_space<vmem>>, vector<256x128xf32>
    %cst = arith.constant dense<0.000000e+00> : vector<8x128xf32>
    %4 = tpu.matmul %2, %3, %cst {dimension_numbers = #tpu.dot_dimension_numbers<[1], [0], [0], [1], [0, 0, 1, 1], [], []>} : vector<8x256xf32>, vector<256x128xf32>, vector<8x128xf32> -> vector<8x128xf32>
    %c0_5 = arith.constant 0 : index
    %c0_6 = arith.constant 0 : index
    %5 = vector.load %arg4[%c0_5, %c0_6] : memref<1x128xf32, #tpu.memory_space<vmem>>, vector<1x128xf32>
    %6 = vector.broadcast %5 : vector<1x128xf32> to vector<8x128xf32>
    %7 = arith.addf %4, %6 : vector<8x128xf32>
    %cst_7 = arith.constant 0.000000e+00 : f32
    %8 = vector.broadcast %cst_7 : f32 to vector<8x128xf32>
    %9 = arith.maximumf %7, %8 : vector<8x128xf32>
    %c0_8 = arith.constant 0 : index
    %c0_9 = arith.constant 0 : index
    %10 = vector.load %arg5[%c0_8, %c0_9] : memref<128x128xf32, #tpu.memory_space<vmem>>, vector<128x128xf32>
    %cst_10 = arith.constant dense<0.000000e+00> : vector<8x128xf32>
    %11 = tpu.matmul %9, %10, %cst_10 {dimension_numbers = #tpu.dot_dimension_numbers<[1], [0], [0], [1], [0, 0, 1, 1], [], []>} : vector<8x128xf32>, vector<128x128xf32>, vector<8x128xf32> -> vector<8x128xf32>
    %c0_11 = arith.constant 0 : index
    %c0_12 = arith.constant 0 : index
    %12 = vector.load %arg6[%c0_11, %c0_12] : memref<1x128xf32, #tpu.memory_space<vmem>>, vector<1x128xf32>
    %13 = vector.broadcast %12 : vector<1x128xf32> to vector<8x128xf32>
    %14 = arith.addf %11, %13 : vector<8x128xf32>
    %c0_13 = arith.constant 0 : index
    %c0_14 = arith.constant 0 : index
    %15 = vector.load %arg7[%c0_13, %c0_14] : memref<8x128xf32, #tpu.memory_space<vmem>>, vector<8x128xf32>
    tpu.vector_store %arg7[%c0_13, %c0_14], %14 {strides = array<i32>} : memref<8x128xf32, #tpu.memory_space<vmem>>, vector<8x128xf32>,
    return
  }
  func.func @transform_0(%arg0: i32) -> (i32, i32) {
    %c0_i32 = arith.constant 0 : i32
    %c0_i32_0 = arith.constant 0 : i32
    return %arg0, %c0_i32 : i32, i32
  }
  func.func @transform_1(%arg0: i32) -> (i32, i32) {
    %c0_i32 = arith.constant 0 : i32
    %c0_i32_0 = arith.constant 0 : i32
    return %arg0, %c0_i32 : i32, i32
  }
  func.func @transform_2(%arg0: i32) -> (i32, i32) {
    %c0_i32 = arith.constant 0 : i32
    %c0_i32_0 = arith.constant 0 : i32
    %c0_i32_1 = arith.constant 0 : i32
    return %c0_i32, %c0_i32_0 : i32, i32
  }
  func.func @transform_3(%arg0: i32) -> (i32, i32) {
    %c0_i32 = arith.constant 0 : i32
    %c0_i32_0 = arith.constant 0 : i32
    %c0_i32_1 = arith.constant 0 : i32
    return %c0_i32, %c0_i32_0 : i32, i32
  }
  func.func @transform_4(%arg0: i32) -> (i32, i32) {
    %c0_i32 = arith.constant 0 : i32
    %c0_i32_0 = arith.constant 0 : i32
    %c0_i32_1 = arith.constant 0 : i32
    return %c0_i32, %c0_i32_0 : i32, i32
  }
  func.func @transform_5(%arg0: i32) -> (i32, i32) {
    %c0_i32 = arith.constant 0 : i32
    %c0_i32_0 = arith.constant 0 : i32
    %c0_i32_1 = arith.constant 0 : i32
    return %c0_i32, %c0_i32_0 : i32, i32
  }
  func.func @transform_6(%arg0: i32) -> (i32, i32) {
    %c0_i32 = arith.constant 0 : i32
    %c0_i32_0 = arith.constant 0 : i32
    return %arg0, %c0_i32 : i32, i32
  }
}

</mosaic_0001>

<bundles_post_ra>
// kernel: tpu_custom_call.1
= control target key start
LH: loop header
LB: loop body
LE: loop exit
PB: predicated region body
PF: predicated region fallthrough
CT: control target
= control target key end

     0   :  { %s1439_s0 = inlined_call_operand.hbm [shape: f32[16,128], index: 0, kind: input, shape index: {}]   ;;  %s1440_s1 = inlined_call_operand.hbm [shape: f32[16,128], index: 1, kind: input, shape index: {}]   ;;  %s1441_s2 = inlined_call_operand.hbm [shape: f32[256,128], index: 2, kind: input, shape index: {}]   ;;  %s1442_s3 = inlined_call_operand.vmem [shape: f32[1,128], index: 3, kind: input, shape index: {}]   ;;  %s1443_s4 = inlined_call_operand.hbm [shape: f32[128,128], index: 4, kind: input, shape index: {}]   ;;  %s1444_s5 = inlined_call_operand.vmem [shape: f32[1,128], index: 5, kind: input, shape index: {}]   ;;  %s1445_s6 = inlined_call_operand.hbm [shape: f32[16,128], index: 6, kind: output, shape index: {}]  }
   0x1   :  { %1450 = sst [smem:[#allocation17_spill]] %s1441_s2 }
   0x2   :  { %1451 = sst [smem:[#allocation18_spill]] %s1443_s4 }
   0x3   :  { %11 = vsyncpa [#allocation3], 0 }
   0x4   :  { %13 = vsyncpa [#allocation3 + $0x1], 0 }
   0x5   :  { %14 = vsyncpa [#allocation6], 0 }
   0x6   :  { %16 = vsyncpa [#allocation6 + $0x1], 0 }
   0x7   :  { %17 = vsyncpa [#allocation9], 0 }
   0x8   :  { %18 = vsyncpa [#allocation4], 0 }
   0x9   :  { %20 = vsyncpa [#allocation4 + $0x1], 0  ;;  %s1147_s21 = smov 0   ;;  %s1149_s22 = smov 0  }
   0xa   :  { %s1151_s23 = smov 0   ;;  %s1153_s24 = smov 0  }
   0xb LB: > { %s1168_s25 = sadd.s32 4294967295, %s1100_s24   ;;  %s665_s26 = sadd.s32 4294967294, %s1100_s24   ;;  %s1100_s24 = sphi %s1153_s24, %s1475_s24   ;;  %s1096_s23 = sphi %s1151_s23, %s1474_s23   ;;  %s1092_s22 = sphi %s1149_s22, %s1473_s22   ;;  %s1088_s21 = sphi %s1147_s21, %s1472_s21  }
   0xc   : > { %p46_p0 = scmp.ne.s32.totalorder %s1092_s22, %s1088_s21  ;;  %p1446_p1 = scmp.eq.s32.totalorder %s1168_s25, 0 }
   0xd   : > { %p186_p3 = scmp.eq.s32.totalorder %s665_s26, 1  ;;  %p666_p5 = scmp.ge.s32.totalorder %s1100_s24, 1 }
   0xe   : > { %p1177_p4 = por %p1446_p1, %p46_p0  ;;  %p193_p7 = scmp.lt.s32.totalorder %s1100_s24, 3 }
   0xf   : > { %p1182_p6 = por %p186_p3, %p46_p0  ;;  %s1102_s30 = smov [#allocation7]  }
  0x10   : > { %s1452_s27 = scalar_select %p1177_p4, 1, 0 }
  0x11   : > { %s1453_s28 = scalar_select %p1182_p6, 1, 0 }
  0x12   : > { %p1187_p8 = pnand %p666_p5, %p193_p7  ;;  %s205_s7 = sshll.u32 %s1102_s30, 4  ;;  %s1191_s7 = int_to_ptr.vmem [resolvable:$true] %s205_s7 }
  0x13   : > { %s1103_s9 = smov [#allocation8]   ;;  %s1456_s2 = sld [smem:[#allocation17_spill]] }
  0x14   : > { %s1454_s29 = scalar_select %p1187_p8, 1, 0 }
  0x15   : > { %p843_p9 = pneg %p1187_p8  ;;  %s221_s10 = sshll.u32 %s1103_s9, 4  ;;  %s1202_s10 = int_to_ptr.vmem [resolvable:$true] %s221_s10 }
  0x17   : > { %p1198_p11 = pnand %p843_p9, %p1446_p1 }
  0x19   : > { %s906_s13 = scalar_lea.hbm %s1456_s2, 4096  ;;  %p908_p13 = pneg %p1198_p11 }
  0x1a   : > { %p907_p12 = scmp.ne.s32.totalorder %s1456_s2, %s906_s13  ;;  %p913_p5 = scmp.lt.u32.totalorder %s906_s13, %s1456_s2 }
  0x1c   : > { %p909_p0 = pnand %p908_p13, %p907_p12 }
  0x1e   : > { %p910_p3 = pneg %p909_p0 }
  0x20   : > { %p915_p7 = pnand %p913_p5, %p910_p3 }
  0x22   : > { %918 = shalt.err (!%p915_p7)
}
  0x23   : > { %s919_s18 = scalar_lea.vmem %s1191_s7, 4096  ;;  %p927_p2 = scmp.lt.s32.totalorder %s1191_s7, %s1191_s7 }
  0x24   : > { %p920_p9 = scmp.ne.s32.totalorder %s1191_s7, %s919_s18  ;;  %p928_p12 = scmp.lt.s32.totalorder %s919_s18, %s919_s18 }
  0x26   : > { %p922_p10 = pnand %p920_p9, %p908_p13  ;;  %p929_p0 = por %p928_p12, %p927_p2 }
  0x28   : > { %p923_p1 = pneg %p922_p10 }
  0x2a   : > { %p930_p6 = pnand %p929_p0, %p923_p1 }
  0x2c   : > { %933 = shalt.err (!%p930_p6)
}
  0x2d   : > { %s1104_s19 = smov 128   ;;  %s1105_s20 = smov 8  }
  0x2e   : > { %846 = dma.hbm_to_vmem [thread:$0]  (!%p1198_p11), %s1456_s2, 4096, %s1191_s7, [#allocation6], %s1104_s19, %s1104_s19, %s1105_s20  }
  0x2f   : > { %s1457_s4 = sld [smem:[#allocation18_spill]] }
  0x35   : > { %s934_s12 = scalar_lea.hbm %s1457_s4, 2048 }
  0x36   : > { %p935_p2 = scmp.ne.s32.totalorder %s1457_s4, %s934_s12  ;;  %p941_p10 = scmp.lt.u32.totalorder %s934_s12, %s1457_s4 }
  0x38   : > { %p937_p1 = pnand %p935_p2, %p908_p13 }
  0x3a   : > { %p938_p6 = pneg %p937_p1 }
  0x3c   : > { %p943_p3 = pnand %p941_p10, %p938_p6 }
  0x3e   : > { %946 = shalt.err (!%p943_p3)
}
  0x3f   : > { %s947_s7 = scalar_lea.vmem %s1202_s10, 2048  ;;  %p955_p12 = scmp.lt.s32.totalorder %s1202_s10, %s1202_s10 }
  0x40   : > { %p948_p5 = scmp.ne.s32.totalorder %s1202_s10, %s947_s7  ;;  %p956_p0 = scmp.lt.s32.totalorder %s947_s7, %s947_s7 }
  0x42   : > { %p950_p7 = pnand %p948_p5, %p908_p13  ;;  %p957_p2 = por %p956_p0, %p955_p12 }
  0x44   : > { %p951_p9 = pneg %p950_p7 }
  0x46   : > { %p958_p1 = pnand %p957_p2, %p951_p9 }
  0x48   : > { %961 = shalt.err (!%p958_p1)
}
  0x49   : > { %849 = dma.hbm_to_vmem [thread:$0]  (!%p1198_p11), %s1457_s4, 2048, %s1202_s10, [#allocation9], %s1104_s19, %s1104_s19, %s1105_s20  }
  0x4a   : > { %s1257_s26 = sadd.s32 1, %s1100_s24   ;;  %s33_s8 = sadd.s32 1, %s1096_s23 }
  0x4b   : > { %s30_s30 = ssub.s32 %s1100_s24, %s1257_s26  ;;  %p40_p13 = scmp.ne.s32.totalorder %s1096_s23, %s1092_s22 }
  0x4c   : > { %p31_p6 = scmp.eq.s32.totalorder %s30_s30, 0  ;;  %p41_p10 = scmp.eq.s32.totalorder %s1100_s24, 0 }
  0x4d   : > { %p1458_p3 = scmp.eq.s32.totalorder %s1168_s25, 1  ;;  %p863_p7 = scmp.lt.s32.totalorder %s1100_s24, 2 }
  0x4e   : > { %s1273_s11 = scalar_select %p31_p6, %s1096_s23, %s33_s8  }
  0x4f   : > { %p1267_p5 = por %p1458_p3, %p40_p13  ;;  %p42_p9 = por %p41_p10, %p40_p13 }
  0x50   : > { %1460 = sst [smem:[#allocation16_spill]] %s1273_s11  ;;  %s238_s12 = sand.u32 1, %s1096_s23  }
  0x51   : > { %s1459_s9 = scalar_select %p1267_p5, 1, 0 }
  0x52   : > { %s1276_s10 = sshll.u32 %s238_s12, 3  ;;  %s671_s19 = sshll.u32 %s1100_s24, 7 }
  0x53   : > { %s1282_s14 = scalar_lea.hbm %s1439_s0, %s671_s19  ;;  %s242_s15 = scalar_lea.vmem [#allocation2], %s1276_s10 }
  0x54   : > { %s249_s16 = sshll.u32 %s242_s15, 4  ;;  %p1287_p11 = pnand %p863_p7, %p42_p9  ;;  %s1285_s16 = int_to_ptr.vmem [resolvable:$true] %s249_s16 }
  0x55   : > { %s1294_s8 = scalar_lea.hbm %s1440_s1, %s671_s19  ;;  %s256_s30 = sand.u32 1, %s1100_s24  }
  0x56   : > { %s239_s20 = scalar_lea.sflag [#allocation3], %s238_s12  ;;  %s962_s13 = scalar_lea.hbm %s1282_s14, 128 }
  0x57   : > { %p963_p12 = scmp.ne.s32.totalorder %s1282_s14, %s962_s13  ;;  %p964_p0 = pneg %p1287_p11 }
  0x58   : > { %s967_s4 = scalar_lea.hbm %s1439_s0, 256  ;;  %p968_p13 = scmp.lt.u32.totalorder %s1282_s14, %s1439_s0 }
  0x59   : > { %p965_p2 = pnand %p964_p0, %p963_p12  ;;  %p969_p6 = scmp.lt.u32.totalorder %s967_s4, %s962_s13 }
  0x5a   : > { %p971_p3 = scmp.lt.u32.totalorder %s962_s13, %s1282_s14 }
  0x5b   : > { %p966_p1 = pneg %p965_p2  ;;  %p970_p10 = por %p969_p6, %p968_p13 }
  0x5d   : > { %p972_p7 = por %p971_p3, %p970_p10 }
  0x5f   : > { %p973_p9 = pnand %p972_p7, %p966_p1 }
  0x61   : > { %976 = shalt.err (!%p973_p9)
}
  0x62   : > { %s977_s12 = scalar_lea.vmem %s1285_s16, 128  ;;  %s1106_s2 = smov [#allocation2]  }
  0x63   : > { %p978_p12 = scmp.ne.s32.totalorder %s1285_s16, %s977_s12  ;;  %s982_s19 = sshll.u32 %s1106_s2, 4  ;;  %s983_s19 = int_to_ptr.vmem [resolvable:$false] %s982_s19 }
  0x64   : > { %s984_s11 = scalar_lea.vmem %s983_s19, 256  ;;  %p985_p4 = scmp.lt.s32.totalorder %s1285_s16, %s983_s19 }
  0x65   : > { %p980_p2 = pnand %p978_p12, %p964_p0  ;;  %p986_p13 = scmp.lt.s32.totalorder %s984_s11, %s977_s12 }
  0x67   : > { %p981_p5 = pneg %p980_p2  ;;  %p987_p6 = por %p986_p13, %p985_p4 }
  0x69   : > { %p988_p10 = pnand %p987_p6, %p981_p5 }
  0x6b   : > { %991 = shalt.err (!%p988_p10)
}
  0x6c   : > { %853 = dma.hbm_to_vmem [thread:$0]  (!%p1287_p11), %s1282_s14, 128, %s1285_s16, %s239_s20  }
  0x6d   : > { %s260_s4 = scalar_lea.vmem [#allocation5], %s1276_s10  ;;  %s257_s13 = scalar_lea.sflag [#allocation6], %s256_s30 }
  0x6e   : > { %s267_s18 = sshll.u32 %s260_s4, 4  ;;  %s992_s15 = scalar_lea.hbm %s1294_s8, 128  ;;  %s268_s18 = int_to_ptr.vmem [resolvable:$true] %s267_s18 }
  0x6f   : > { %p993_p4 = scmp.ne.s32.totalorder %s1294_s8, %s992_s15  ;;  %s997_s2 = scalar_lea.hbm %s1440_s1, 256 }
  0x70   : > { %p998_p3 = scmp.lt.u32.totalorder %s1294_s8, %s1440_s1  ;;  %p999_p7 = scmp.lt.u32.totalorder %s997_s2, %s992_s15 }
  0x71   : > { %p995_p5 = pnand %p993_p4, %p964_p0  ;;  %p1001_p12 = scmp.lt.u32.totalorder %s992_s15, %s1294_s8 }
  0x72   : > { %p1000_p9 = por %p999_p7, %p998_p3 }
  0x73   : > { %p996_p1 = pneg %p995_p5 }
  0x74   : > { %p1002_p2 = por %p1001_p12, %p1000_p9 }
  0x76   : > { %p1003_p13 = pnand %p1002_p2, %p996_p1 }
  0x78   : > { %1006 = shalt.err (!%p1003_p13)
}
  0x79   : > { %s1007_s10 = scalar_lea.vmem %s268_s18, 128  ;;  %s1107_s14 = smov [#allocation5]  }
  0x7a   : > { %p1008_p6 = scmp.ne.s32.totalorder %s268_s18, %s1007_s10  ;;  %s1012_s16 = sshll.u32 %s1107_s14, 4  ;;  %s1013_s16 = int_to_ptr.vmem [resolvable:$false] %s1012_s16 }
  0x7b   : > { %s1014_s30 = scalar_lea.vmem %s1013_s16, 256  ;;  %p1015_p5 = scmp.lt.s32.totalorder %s268_s18, %s1013_s16 }
  0x7c   : > { %p1010_p10 = pnand %p1008_p6, %p964_p0  ;;  %p1016_p8 = scmp.lt.s32.totalorder %s1014_s30, %s1007_s10 }
  0x7e   : > { %p1011_p4 = pneg %p1010_p10  ;;  %p1017_p3 = por %p1016_p8, %p1015_p5 }
  0x80   : > { %p1018_p7 = pnand %p1017_p3, %p1011_p4 }
  0x82   : > { %1021 = shalt.err (!%p1018_p7)
}
  0x83   : > { %856 = dma.hbm_to_vmem [thread:$0]  (!%p1287_p11), %s1294_s8, 128, %s268_s18, %s257_s13  }
  0x84   : > { %p1462_p1 = scmp.ne.s32.totalorder %s1454_s29, 0 }
  0x85   : > { %s1347_s20 = sand.u32 (!%p1462_p1), 1, %s1092_s22   ;;  %p1463_p8 = scmp.ne.s32.totalorder (!%p1462_p1), %s1452_s27, 0 }
  0x86   : > { %276 = sbr.rel (%p1462_p1) target bundleno = 634 (0x27a), region = 44  ;;  %s1350_s4 = sshll.u32 (!%p1462_p1), %s1347_s20, 3 }
  0x87   : > { %s279_s15 = scalar_lea.sflag (!%p1462_p1), [#allocation3], %s1347_s20  ;;  %s282_s17 = scalar_lea.vmem (!%p1462_p1), [#allocation2], %s1350_s4 }
  0x8d   : > { %1067 = dma.done.wait (%p1463_p8), %s279_s15, 128  }
  0x8e   : > { %1069 = vsyncadd (%p1463_p8), %s279_s15, 4294967168  ;;  %s287_s29 = sand.u32 1, %s1168_s25   ;;  %s291_s8 = scalar_lea.vmem [#allocation5], %s1350_s4 }
  0x8f   : > { %s288_s7 = scalar_lea.sflag [#allocation6], %s287_s29 }
  0x90   : > { %1071 = dma.done.wait (%p1463_p8), %s288_s7, 128  }
  0x91   : > { %1073 = vsyncadd (%p1463_p8), %s288_s7, 4294967168  ;;  %p1464_p11 = scmp.eq.s32.totalorder %s1168_s25, 0 }
  0x93   : > { %1075 = dma.done.wait (%p1464_p11), [#allocation6], 4096   ;;  %p1465_p0 = pmov %p1464_p11 }
  0x95   : > { %1077 = vsyncadd (%p1465_p0), [#allocation6], 4294963200  ;;  %p1466_p9 = pmov %p1465_p0 }
  0x96   : > { %p1467_p12 = pmov %p1465_p0 }
  0x97   : > { %1079 = dma.done.wait (%p1466_p9), [#allocation9], 2048  }
  0x98   : > { %1081 = vsyncadd (%p1467_p12), [#allocation9], 4294965248  ;;  %v1108_v0 = vmov 0.0|0.0   ;;  %v351_v1 = vld [vmem:[#allocation7 + $0x80] sm:$0xff]  ;;  %v352_v2 = vld [vmem:[#allocation7 + $0x88] sm:$0xff]  ;;  %vm1109_vm0 = vmmov 0  }
  0x99   : > { %805 = vmatprep.subr.bf16.mxu1 %v1108_v0  ;;  %v335_v3 = vld [vmem:[#allocation7] sm:$0xff]  ;;  %v773_v4 = vpack.c.bf16 %v352_v2, %v351_v1  ;;  %v336_v5 = vld [vmem:[#allocation7 + $0x8] sm:$0xff]  ;;  %v353_v6 = vld [vmem:[#allocation7 + $0x90] sm:$0xff]  ;;  %s683_s2 = sshll.u32 %s1168_s25, 7  ;;  %s332_s19 = scalar_lea.vmem [#allocation10], %s1350_s4 }
  0x9a   : > { %v354_v7 = vld [vmem:[#allocation7 + $0x98] sm:$0xff]  ;;  %v775_v8 = vpack.c.bf16 %v336_v5, %v335_v3  ;;  %v337_v10 = vld [vmem:[#allocation7 + $0x10] sm:$0xff]  ;;  %v355_v12 = vld [vmem:[#allocation7 + $0xa0] sm:$0xff]  ;;  %s553_s11 = sshll.u32 %s332_s19, 4  ;;  %s1395_s16 = scalar_lea.hbm %s1445_s6, %s683_s2  ;;  %s1397_s11 = int_to_ptr.vmem [resolvable:$true] %s553_s11 }
  0x9b   : > { %v777_v9 = vpack.c.bf16 %v354_v7, %v353_v6  ;;  %v338_v11 = vld [vmem:[#allocation7 + $0x18] sm:$0xff]  ;;  %774 = vmatprep.subr.bf16.mxu0 %v773_v4  ;;  %v356_v13 = vld [vmem:[#allocation7 + $0xa8] sm:$0xff]  ;;  %v339_v16 = vld [vmem:[#allocation7 + $0x20] sm:$0xff]  ;;  %s540_s30 = scalar_lea.sflag [#allocation4], %s1347_s20  ;;  %s1022_s15 = scalar_lea.vmem %s1397_s11, 128 }
  0x9c   : > { %776 = vmatpush3.bf16.msra.mxu0 %v775_v8  ;;  %v779_v14 = vpack.c.bf16 %v338_v11, %v337_v10  ;;  %v781_v15 = vpack.c.bf16 %v356_v13, %v355_v12  ;;  %v340_v17 = vld [vmem:[#allocation7 + $0x28] sm:$0xff]  ;;  %v357_v18 = vld [vmem:[#allocation7 + $0xb0] sm:$0xff]  ;;  %v358_v19 = vld [vmem:[#allocation7 + $0xb8] sm:$0xff]  ;;  %v1110_v12 = vmov 0.0   ;;  %p1023_p2 = scmp.ne.s32.totalorder %s1397_s11, %s1022_s15  ;;  %p1468_p13 = scmp.ne.s32.totalorder %s1459_s9, 0 }
  0x9d   : > { %778 = vmatprep.subr.bf16.mxu0 %v777_v9  ;;  %v783_v20 = vpack.c.bf16 %v340_v17, %v339_v16  ;;  %v785_v21 = vpack.c.bf16 %v358_v19, %v357_v18  ;;  %v341_v22 = vld [vmem:[#allocation7 + $0x30] sm:$0xff]  ;;  %v342_v23 = vld [vmem:[#allocation7 + $0x38] sm:$0xff]  ;;  %v359_v24 = vld [vmem:[#allocation7 + $0xc0] sm:$0xff]  ;;  %770 = vmatprep.mubr.msk.f32.mxu1 %vm1109_vm0, %v1110_v12  ;;  %s1111_s25 = smov [#allocation10]  }
  0x9e   : > { %v360_v25 = vld [vmem:[#allocation7 + $0xc8] sm:$0xff]  ;;  %v334_v26 = vld [vmem:[%s291_s8] sm:$0xff]  ;;  %v445_v27 = vld [vmem:[#allocation8] sm:$0xff]  ;;  %v787_v29 = vpack.c.bf16 %v342_v23, %v341_v22  ;;  %p1024_p6 = pnand %p1023_p2, %p1468_p13  ;;  %s1026_s4 = sshll.u32 %s1111_s25, 4  ;;  %s1027_s4 = int_to_ptr.vmem [resolvable:$false] %s1026_s4 }
  0x9f   : > { %438 = vmatprep.mubr.f32.mxu0 %v334_v26  ;;  %v446_v28 = vld [vmem:[#allocation8 + $0x8] sm:$0xff]  ;;  %v447_v31 = vld [vmem:[#allocation8 + $0x10] sm:$0xff]  ;;  %v448_v32 = vld [vmem:[#allocation8 + $0x18] sm:$0xff]  ;;  %v789_v33 = vpack.c.bf16 %v360_v25, %v359_v24  ;;  %p1029_p4 = scmp.lt.s32.totalorder %s1397_s11, %s1027_s4 }
  0xa0   : > { %780 = vmatpush3.bf16.msra.mxu0 %v779_v14  ;;  %v806_v30 = vpack.c.bf16 %v446_v28, %v445_v27  ;;  %v343_v34 = vld [vmem:[#allocation7 + $0x40] sm:$0xff]  ;;  %v344_v35 = vld [vmem:[#allocation7 + $0x48] sm:$0xff]  ;;  %v361_v36 = vld [vmem:[#allocation7 + $0xd0] sm:$0xff]  ;;  %v809_v38 = vpack.c.bf16 %v448_v32, %v447_v31  ;;  %p1025_p10 = pneg %p1024_p6 }
  0xa1   : > { %782 = vmatprep.subr.bf16.mxu0 %v781_v15  ;;  %v362_v37 = vld [vmem:[#allocation7 + $0xd8] sm:$0xff]  ;;  %v449_v39 = vld [vmem:[#allocation8 + $0x20] sm:$0xff]  ;;  %v450_v40 = vld [vmem:[#allocation8 + $0x28] sm:$0xff]  ;;  %v791_v41 = vpack.c.bf16 %v344_v35, %v343_v34 }
  0xa2   : > { %807 = vmatpush3.bf16.msra.mxu1 %v806_v30  ;;  %v793_v42 = vpack.c.bf16 %v362_v37, %v361_v36  ;;  %v345_v43 = vld [vmem:[#allocation7 + $0x50] sm:$0xff]  ;;  %v346_v44 = vld [vmem:[#allocation7 + $0x58] sm:$0xff]  ;;  %v363_v45 = vld [vmem:[#allocation7 + $0xe0] sm:$0xff]  ;;  %v812_v47 = vpack.c.bf16 %v450_v40, %v449_v39 }
  0xa3   : > { %808 = vmatprep.subr.bf16.mxu1 %v1108_v0  ;;  %v364_v46 = vld [vmem:[#allocation7 + $0xe8] sm:$0xff]  ;;  %v451_v48 = vld [vmem:[#allocation8 + $0x30] sm:$0xff]  ;;  %v452_v49 = vld [vmem:[#allocation8 + $0x38] sm:$0xff]  ;;  %v795_v50 = vpack.c.bf16 %v346_v44, %v345_v43 }
  0xa4   : > { %784 = vmatpush3.bf16.msra.mxu0 %v783_v20  ;;  %v797_v51 = vpack.c.bf16 %v364_v46, %v363_v45  ;;  %v347_v52 = vld [vmem:[#allocation7 + $0x60] sm:$0xff]  ;;  %v348_v53 = vld [vmem:[#allocation7 + $0x68] sm:$0xff]  ;;  %v365_v54 = vld [vmem:[#allocation7 + $0xf0] sm:$0xff]  ;;  %v815_v56 = vpack.c.bf16 %v452_v49, %v451_v48 }
  0xa5   : > { %786 = vmatprep.subr.bf16.mxu0 %v785_v21  ;;  %v366_v55 = vld [vmem:[#allocation7 + $0xf8] sm:$0xff]  ;;  %v453_v57 = vld [vmem:[#allocation8 + $0x40] sm:$0xff]  ;;  %v454_v58 = vld [vmem:[#allocation8 + $0x48] sm:$0xff]  ;;  %v799_v59 = vpack.c.bf16 %v348_v53, %v347_v52 }
  0xa6   : > { %810 = vmatpush3.bf16.msra.mxu1 %v809_v38  ;;  %v801_v60 = vpack.c.bf16 %v366_v55, %v365_v54  ;;  %v349_v61 = vld [vmem:[#allocation7 + $0x70] sm:$0xff]  ;;  %v350_v62 = vld [vmem:[#allocation7 + $0x78] sm:$0xff]  ;;  %v818_v63 = vpack.c.bf16 %v454_v58, %v453_v57  ;;  %v333_v5 = vld [vmem:[%s282_s17] sm:$0xff]  ;;  %s1028_s17 = scalar_lea.vmem %s1027_s4, 256 }
  0xa7   : > { %811 = vmatprep.subr.bf16.mxu1 %v1108_v0  ;;  %v455_v1 = vld [vmem:[#allocation8 + $0x50] sm:$0xff]  ;;  %v456_v2 = vld [vmem:[#allocation8 + $0x58] sm:$0xff]  ;;  %v803_v3 = vpack.c.bf16 %v350_v62, %v349_v61  ;;  %v457_v6 = vld [vmem:[#allocation8 + $0x60] sm:$0xff]  ;;  %p1030_p5 = scmp.lt.s32.totalorder %s1028_s17, %s1022_s15 }
  0xa8   : > { %788 = vmatpush3.bf16.msra.mxu0 %v787_v29  ;;  %v821_v4 = vpack.c.bf16 %v456_v2, %v455_v1  ;;  %v458_v7 = vld [vmem:[#allocation8 + $0x68] sm:$0xff]  ;;  %v459_v9 = vld [vmem:[#allocation8 + $0x70] sm:$0xff]  ;;  %v460_v10 = vld [vmem:[#allocation8 + $0x78] sm:$0xff] }
  0xa9   : > { %790 = vmatprep.subr.bf16.mxu0 %v789_v33  ;;  %v824_v8 = vpack.c.bf16 %v458_v7, %v457_v6  ;;  %v827_v11 = vpack.c.bf16 %v460_v10, %v459_v9  ;;  %v680_v14 = vld [vmem:[%s1442_s3] ss:$0 sm:$0xff]  ;;  %p1031_p3 = por %p1030_p5, %p1029_p4 }
  0xaa   : > { %813 = vmatpush3.bf16.msra.mxu1 %v812_v47  ;;  %v681_v18 = vld [vmem:[%s1444_s5] ss:$0 sm:$0xff] }
  0xab   : > { %814 = vmatprep.subr.bf16.mxu1 %v1108_v0  ;;  %p1032_p7 = pnand %p1031_p3, %p1025_p10 }
  0xac   : > { %792 = vmatpush3.bf16.msra.mxu0 %v791_v41 }
  0xad   : > { %794 = vmatprep.subr.bf16.mxu0 %v793_v42 }
  0xae   : > { %816 = vmatpush3.bf16.msra.mxu1 %v815_v56 }
  0xaf   : > { %817 = vmatprep.subr.bf16.mxu1 %v1108_v0 }
  0xb0   : > { %796 = vmatpush3.bf16.msra.mxu0 %v795_v50 }
  0xb1   : > { %798 = vmatprep.subr.bf16.mxu0 %v797_v51 }
  0xb2   : > { %819 = vmatpush3.bf16.msra.mxu1 %v818_v63 }
  0xb3   : > { %820 = vmatprep.subr.bf16.mxu1 %v1108_v0 }
  0xb4   : > { %800 = vmatpush3.bf16.msra.mxu0 %v799_v59 }
  0xb5   : > { %802 = vmatprep.subr.bf16.mxu0 %v801_v60 }
  0xb6   : > { %822 = vmatpush3.bf16.msra.mxu1 %v821_v4 }
  0xb7   : > { %823 = vmatprep.subr.bf16.mxu1 %v1108_v0 }
  0xb8   : > { %804 = vmatpush3.bf16.msra.mxu0 %v803_v3 }
  0xba   : > { %825 = vmatpush3.bf16.msra.mxu1 %v824_v8 }
  0xbb   : > { %439 = vmatmul.mubr.f32.vlgmr.msra.gmra.mrb[0].mxu0 %v333_v5  ;;  %826 = vmatprep.subr.bf16.mxu1 %v1108_v0 }
  0xbe   : > { %828 = vmatpush3.bf16.msra.mxu1 %v827_v11 }
 0x18e   : > { %v718_v13 = vpop.f32.mrb[0].mxu0 }
 0x18f   : > { %v719_v15 = vpop.f32.mrb[1].mxu0 }
 0x190   : > { %v720_v16 = vadd.f32 %v719_v15, %v718_v13 }
 0x192   : > { %v441_v17 = vadd.f32 %v720_v16, %v680_v14 }
 0x194   : > { %v444_v0 = vmax.f32 %v441_v17, 0.0 }
 0x196   : > { %771 = vmatmul.mubr.f32.vlgmr.msra.gmra.mrb[0].mxu1 %v444_v0 }
 0x269   : > { %v534_v19 = vpop.f32.mrb[0].mxu1 }
 0x26a   : > { %v535_v20 = vadd.f32 %v681_v18, %v534_v19  ;;  %v772_v21 = vpop.f32.mrb[1].mxu1 }
 0x26c   : > { %538 = vst [vmem:[%s332_s19] sm:$0xff] %v535_v20 }
 0x26d   : > { %1035 = shalt.err (!%p1032_p7)
}
 0x26e   : > { %s1036_s20 = scalar_lea.hbm %s1395_s16, 128  ;;  %s1040_s8 = scalar_lea.hbm %s1445_s6, 256 }
 0x26f   : > { %p1037_p1 = scmp.ne.s32.totalorder %s1395_s16, %s1036_s20  ;;  %p1041_p0 = scmp.lt.u32.totalorder %s1395_s16, %s1445_s6 }
 0x270   : > { %p1042_p9 = scmp.lt.u32.totalorder %s1040_s8, %s1036_s20  ;;  %p1044_p2 = scmp.lt.u32.totalorder %s1036_s20, %s1395_s16 }
 0x271   : > { %p1038_p8 = pnand %p1037_p1, %p1468_p13 }
 0x272   : > { %p1043_p12 = por %p1042_p9, %p1041_p0 }
 0x273   : > { %p1039_p11 = pneg %p1038_p8 }
 0x274   : > { %p1045_p6 = por %p1044_p2, %p1043_p12 }
 0x276   : > { %p1046_p10 = pnand %p1045_p6, %p1039_p11 }
 0x278   : > { %1049 = shalt.err (!%p1046_p10)
}
 0x279   : > { %841 = dma.vmem_to_hbm [thread:$0]  (%p1468_p13), %s1397_s11, 128, %s1395_s16, %s540_s30  }
 0x27a PF: > { %s565_s13 = sand.u32 1, %s1088_s21   ;;  %p1469_p4 = scmp.ne.s32.totalorder %s1453_s28, 0 }
 0x27b   : > { %p1470_p5 = scmp.ge.s32.totalorder %s1100_s24, 2  ;;  %s566_s12 = scalar_lea.sflag [#allocation4], %s565_s13 }
 0x27d   : > { %p858_p3 = pnand %p1470_p5, %p1469_p4 }
 0x27f   : > { %1083 = dma.done.wait (!%p858_p3), %s566_s12, 128  }
 0x280   : > { %1085 = vsyncadd (!%p858_p3), %s566_s12, 4294967168  ;;  %s1471_s2 = sld [smem:[#allocation16_spill]]  ;;  %p23_p7 = scmp.ge.s32.totalorder %s1257_s26, 4  }
 0x281   : > { %s1472_s21 = smov %s1092_s22  ;;  %s1473_s22 = smov %s1096_s23 }
 0x282   : > { %s1475_s24 = smov %s1257_s26  ;;  %25 = sbr.rel (!%p23_p7) target bundleno = 11 (0xb), region = 110 }
 0x286   : > { %s1474_s23 = smov %s1471_s2 }
 0x289   :  { %571 = vsyncpa [#allocation3], 1 }
 0x28a   :  { %573 = vsyncpa [#allocation3 + $0x1], 1 }
 0x28b   :  { %574 = vsyncpa [#allocation6], 1 }
 0x28c   :  { %576 = vsyncpa [#allocation6 + $0x1], 1 }
 0x28d   :  { %577 = vsyncpa [#allocation9], 1 }
 0x28e   :  { %578 = vsyncpa [#allocation4], 1 }
 0x28f   :  { %580 = vsyncpa [#allocation4 + $0x1], 1 }

// kernel: tpu_custom_call.1
= control target key start
LH: loop header
LB: loop body
LE: loop exit
PB: predicated region body
PF: predicated region fallthrough
CT: control target
= control target key end

     0   :  { %s1439_s0 = inlined_call_operand.hbm [shape: f32[16,128], index: 0, kind: input, shape index: {}]   ;;  %s1440_s1 = inlined_call_operand.hbm [shape: f32[16,128], index: 1, kind: input, shape index: {}]   ;;  %s1441_s2 = inlined_call_operand.hbm [shape: f32[256,128], index: 2, kind: input, shape index: {}]   ;;  %s1442_s3 = inlined_call_operand.vmem [shape: f32[1,128], index: 3, kind: input, shape index: {}]   ;;  %s1443_s4 = inlined_call_operand.hbm [shape: f32[128,128], index: 4, kind: input, shape index: {}]   ;;  %s1444_s5 = inlined_call_operand.vmem [shape: f32[1,128], index: 5, kind: input, shape index: {}]   ;;  %s1445_s6 = inlined_call_operand.hbm [shape: f32[16,128], index: 6, kind: output, shape index: {}]  }
   0x1   :  { %1450 = sst [smem:[#allocation17_spill]] %s1441_s2 }
   0x2   :  { %1451 = sst [smem:[#allocation18_spill]] %s1443_s4 }
   0x3   :  { %11 = vsyncpa [#allocation3], 0 }
   0x4   :  { %13 = vsyncpa [#allocation3 + $0x1], 0 }
   0x5   :  { %14 = vsyncpa [#allocation6], 0 }
   0x6   :  { %16 = vsyncpa [#allocation6 + $0x1], 0 }
   0x7   :  { %17 = vsyncpa [#allocation9], 0 }
   0x8   :  { %18 = vsyncpa [#allocation4], 0 }
   0x9   :  { %20 = vsyncpa [#allocation4 + $0x1], 0  ;;  %s1147_s21 = smov 0   ;;  %s1149_s22 = smov 0  }
   0xa   :  { %s1151_s23 = smov 0   ;;  %s1153_s24 = smov 0  }
   0xb LB: > { %s1168_s25 = sadd.s32 4294967295, %s1100_s24   ;;  %s665_s26 = sadd.s32 4294967294, %s1100_s24   ;;  %s1100_s24 = sphi %s1153_s24, %s1475_s24   ;;  %s1096_s23 = sphi %s1151_s23, %s1474_s23   ;;  %s1092_s22 = sphi %s1149_s22, %s1473_s22   ;;  %s1088_s21 = sphi %s1147_s21, %s1472_s21  }
   0xc   : > { %p46_p0 = scmp.ne.s32.totalorder %s1092_s22, %s1088_s21  ;;  %p1446_p1 = scmp.eq.s32.totalorder %s1168_s25, 0 }
   0xd   : > { %p186_p3 = scmp.eq.s32.totalorder %s665_s26, 1  ;;  %p666_p5 = scmp.ge.s32.totalorder %s1100_s24, 1 }
   0xe   : > { %p1177_p4 = por %p1446_p1, %p46_p0  ;;  %p193_p7 = scmp.lt.s32.totalorder %s1100_s24, 3 }
   0xf   : > { %p1182_p6 = por %p186_p3, %p46_p0  ;;  %s1102_s30 = smov [#allocation7]  }
  0x10   : > { %s1452_s27 = scalar_select %p1177_p4, 1, 0 }
  0x11   : > { %s1453_s28 = scalar_select %p1182_p6, 1, 0 }
  0x12   : > { %p1187_p8 = pnand %p666_p5, %p193_p7  ;;  %s205_s7 = sshll.u32 %s1102_s30, 4  ;;  %s1191_s7 = int_to_ptr.vmem [resolvable:$true] %s205_s7 }
  0x13   : > { %s1103_s9 = smov [#allocation8]   ;;  %s1456_s2 = sld [smem:[#allocation17_spill]] }
  0x14   : > { %s1454_s29 = scalar_select %p1187_p8, 1, 0 }
  0x15   : > { %p843_p9 = pneg %p1187_p8  ;;  %s221_s10 = sshll.u32 %s1103_s9, 4  ;;  %s1202_s10 = int_to_ptr.vmem [resolvable:$true] %s221_s10 }
  0x17   : > { %p1198_p11 = pnand %p843_p9, %p1446_p1 }
  0x19   : > { %s906_s13 = scalar_lea.hbm %s1456_s2, 4096  ;;  %p908_p13 = pneg %p1198_p11 }
  0x1a   : > { %p907_p12 = scmp.ne.s32.totalorder %s1456_s2, %s906_s13  ;;  %p913_p5 = scmp.lt.u32.totalorder %s906_s13, %s1456_s2 }
  0x1c   : > { %p909_p0 = pnand %p908_p13, %p907_p12 }
  0x1e   : > { %p910_p3 = pneg %p909_p0 }
  0x20   : > { %p915_p7 = pnand %p913_p5, %p910_p3 }
  0x22   : > { %918 = shalt.err (!%p915_p7)
}
  0x23   : > { %s919_s18 = scalar_lea.vmem %s1191_s7, 4096  ;;  %p927_p2 = scmp.lt.s32.totalorder %s1191_s7, %s1191_s7 }
  0x24   : > { %p920_p9 = scmp.ne.s32.totalorder %s1191_s7, %s919_s18  ;;  %p928_p12 = scmp.lt.s32.totalorder %s919_s18, %s919_s18 }
  0x26   : > { %p922_p10 = pnand %p920_p9, %p908_p13  ;;  %p929_p0 = por %p928_p12, %p927_p2 }
  0x28   : > { %p923_p1 = pneg %p922_p10 }
  0x2a   : > { %p930_p6 = pnand %p929_p0, %p923_p1 }
  0x2c   : > { %933 = shalt.err (!%p930_p6)
}
  0x2d   : > { %s1104_s19 = smov 128   ;;  %s1105_s20 = smov 8  }
  0x2e   : > { %846 = dma.hbm_to_vmem [thread:$0]  (!%p1198_p11), %s1456_s2, 4096, %s1191_s7, [#allocation6], %s1104_s19, %s1104_s19, %s1105_s20  }
  0x2f   : > { %s1457_s4 = sld [smem:[#allocation18_spill]] }
  0x35   : > { %s934_s12 = scalar_lea.hbm %s1457_s4, 2048 }
  0x36   : > { %p935_p2 = scmp.ne.s32.totalorder %s1457_s4, %s934_s12  ;;  %p941_p10 = scmp.lt.u32.totalorder %s934_s12, %s1457_s4 }
  0x38   : > { %p937_p1 = pnand %p935_p2, %p908_p13 }
  0x3a   : > { %p938_p6 = pneg %p937_p1 }
  0x3c   : > { %p943_p3 = pnand %p941_p10, %p938_p6 }
  0x3e   : > { %946 = shalt.err (!%p943_p3)
}
  0x3f   : > { %s947_s7 = scalar_lea.vmem %s1202_s10, 2048  ;;  %p955_p12 = scmp.lt.s32.totalorder %s1202_s10, %s1202_s10 }
  0x40   : > { %p948_p5 = scmp.ne.s32.totalorder %s1202_s10, %s947_s7  ;;  %p956_p0 = scmp.lt.s32.totalorder %s947_s7, %s947_s7 }
  0x42   : > { %p950_p7 = pnand %p948_p5, %p908_p13  ;;  %p957_p2 = por %p956_p0, %p955_p12 }
  0x44   : > { %p951_p9 = pneg %p950_p7 }
  0x46   : > { %p958_p1 = pnand %p957_p2, %p951_p9 }
  0x48   : > { %961 = shalt.err (!%p958_p1)
}
  0x49   : > { %849 = dma.hbm_to_vmem [thread:$0]  (!%p1198_p11), %s1457_s4, 2048, %s1202_s10, [#allocation9], %s1104_s19, %s1104_s19, %s1105_s20  }
  0x4a   : > { %s1257_s26 = sadd.s32 1, %s1100_s24   ;;  %s33_s8 = sadd.s32 1, %s1096_s23 }
  0x4b   : > { %s30_s30 = ssub.s32 %s1100_s24, %s1257_s26  ;;  %p40_p13 = scmp.ne.s32.totalorder %s1096_s23, %s1092_s22 }
  0x4c   : > { %p31_p6 = scmp.eq.s32.totalorder %s30_s30, 0  ;;  %p41_p10 = scmp.eq.s32.totalorder %s1100_s24, 0 }
  0x4d   : > { %p1458_p3 = scmp.eq.s32.totalorder %s1168_s25, 1  ;;  %p863_p7 = scmp.lt.s32.totalorder %s1100_s24, 2 }
  0x4e   : > { %s1273_s11 = scalar_select %p31_p6, %s1096_s23, %s33_s8  }
  0x4f   : > { %p1267_p5 = por %p1458_p3, %p40_p13  ;;  %p42_p9 = por %p41_p10, %p40_p13 }
  0x50   : > { %1460 = sst [smem:[#allocation16_spill]] %s1273_s11  ;;  %s238_s12 = sand.u32 1, %s1096_s23  }
  0x51   : > { %s1459_s9 = scalar_select %p1267_p5, 1, 0 }
  0x52   : > { %s1276_s10 = sshll.u32 %s238_s12, 3  ;;  %s671_s19 = sshll.u32 %s1100_s24, 7 }
  0x53   : > { %s1282_s14 = scalar_lea.hbm %s1439_s0, %s671_s19  ;;  %s242_s15 = scalar_lea.vmem [#allocation2], %s1276_s10 }
  0x54   : > { %s249_s16 = sshll.u32 %s242_s15, 4  ;;  %p1287_p11 = pnand %p863_p7, %p42_p9  ;;  %s1285_s16 = int_to_ptr.vmem [resolvable:$true] %s249_s16 }
  0x55   : > { %s1294_s8 = scalar_lea.hbm %s1440_s1, %s671_s19  ;;  %s256_s30 = sand.u32 1, %s1100_s24  }
  0x56   : > { %s239_s20 = scalar_lea.sflag [#allocation3], %s238_s12  ;;  %s962_s13 = scalar_lea.hbm %s1282_s14, 128 }
  0x57   : > { %p963_p12 = scmp.ne.s32.totalorder %s1282_s14, %s962_s13  ;;  %p964_p0 = pneg %p1287_p11 }
  0x58   : > { %s967_s4 = scalar_lea.hbm %s1439_s0, 256  ;;  %p968_p13 = scmp.lt.u32.totalorder %s1282_s14, %s1439_s0 }
  0x59   : > { %p965_p2 = pnand %p964_p0, %p963_p12  ;;  %p969_p6 = scmp.lt.u32.totalorder %s967_s4, %s962_s13 }
  0x5a   : > { %p971_p3 = scmp.lt.u32.totalorder %s962_s13, %s1282_s14 }
  0x5b   : > { %p966_p1 = pneg %p965_p2  ;;  %p970_p10 = por %p969_p6, %p968_p13 }
  0x5d   : > { %p972_p7 = por %p971_p3, %p970_p10 }
  0x5f   : > { %p973_p9 = pnand %p972_p7, %p966_p1 }
  0x61   : > { %976 = shalt.err (!%p973_p9)
}
  0x62   : > { %s977_s12 = scalar_lea.vmem %s1285_s16, 128  ;;  %s1106_s2 = smov [#allocation2]  }
  0x63   : > { %p978_p12 = scmp.ne.s32.totalorder %s1285_s16, %s977_s12  ;;  %s982_s19 = sshll.u32 %s1106_s2, 4  ;;  %s983_s19 = int_to_ptr.vmem [resolvable:$false] %s982_s19 }
  0x64   : > { %s984_s11 = scalar_lea.vmem %s983_s19, 256  ;;  %p985_p4 = scmp.lt.s32.totalorder %s1285_s16, %s983_s19 }
  0x65   : > { %p980_p2 = pnand %p978_p12, %p964_p0  ;;  %p986_p13 = scmp.lt.s32.totalorder %s984_s11, %s977_s12 }
  0x67   : > { %p981_p5 = pneg %p980_p2  ;;  %p987_p6 = por %p986_p13, %p985_p4 }
  0x69   : > { %p988_p10 = pnand %p987_p6, %p981_p5 }
  0x6b   : > { %991 = shalt.err (!%p988_p10)
}
  0x6c   : > { %853 = dma.hbm_to_vmem [thread:$0]  (!%p1287_p11), %s1282_s14, 128, %s1285_s16, %s239_s20  }
  0x6d   : > { %s260_s4 = scalar_lea.vmem [#allocation5], %s1276_s10  ;;  %s257_s13 = scalar_lea.sflag [#allocation6], %s256_s30 }
  0x6e   : > { %s267_s18 = sshll.u32 %s260_s4, 4  ;;  %s992_s15 = scalar_lea.hbm %s1294_s8, 128  ;;  %s268_s18 = int_to_ptr.vmem [resolvable:$true] %s267_s18 }
  0x6f   : > { %p993_p4 = scmp.ne.s32.totalorder %s1294_s8, %s992_s15  ;;  %s997_s2 = scalar_lea.hbm %s1440_s1, 256 }
  0x70   : > { %p998_p3 = scmp.lt.u32.totalorder %s1294_s8, %s1440_s1  ;;  %p999_p7 = scmp.lt.u32.totalorder %s997_s2, %s992_s15 }
  0x71   : > { %p995_p5 = pnand %p993_p4, %p964_p0  ;;  %p1001_p12 = scmp.lt.u32.totalorder %s992_s15, %s1294_s8 }
  0x72   : > { %p1000_p9 = por %p999_p7, %p998_p3 }
  0x73   : > { %p996_p1 = pneg %p995_p5 }
  0x74   : > { %p1002_p2 = por %p1001_p12, %p1000_p9 }
  0x76   : > { %p1003_p13 = pnand %p1002_p2, %p996_p1 }
  0x78   : > { %1006 = shalt.err (!%p1003_p13)
}
  0x79   : > { %s1007_s10 = scalar_lea.vmem %s268_s18, 128  ;;  %s1107_s14 = smov [#allocation5]  }
  0x7a   : > { %p1008_p6 = scmp.ne.s32.totalorder %s268_s18, %s1007_s10  ;;  %s1012_s16 = sshll.u32 %s1107_s14, 4  ;;  %s1013_s16 = int_to_ptr.vmem [resolvable:$false] %s1012_s16 }
  0x7b   : > { %s1014_s30 = scalar_lea.vmem %s1013_s16, 256  ;;  %p1015_p5 = scmp.lt.s32.totalorder %s268_s18, %s1013_s16 }
  0x7c   : > { %p1010_p10 = pnand %p1008_p6, %p964_p0  ;;  %p1016_p8 = scmp.lt.s32.totalorder %s1014_s30, %s1007_s10 }
  0x7e   : > { %p1011_p4 = pneg %p1010_p10  ;;  %p1017_p3 = por %p1016_p8, %p1015_p5 }
  0x80   : > { %p1018_p7 = pnand %p1017_p3, %p1011_p4 }
  0x82   : > { %1021 = shalt.err (!%p1018_p7)
}
  0x83   : > { %856 = dma.hbm_to_vmem [thread:$0]  (!%p1287_p11), %s1294_s8, 128, %s268_s18, %s257_s13  }
  0x84   : > { %p1462_p1 = scmp.ne.s32.totalorder %s1454_s29, 0 }
  0x85   : > { %s1347_s20 = sand.u32 (!%p1462_p1), 1, %s1092_s22   ;;  %p1463_p8 = scmp.ne.s32.totalorder (!%p1462_p1), %s1452_s27, 0 }
  0x86   : > { %276 = sbr.rel (%p1462_p1) target bundleno = 634 (0x27a), region = 44  ;;  %s1350_s4 = sshll.u32 (!%p1462_p1), %s1347_s20, 3 }
  0x87   : > { %s279_s15 = scalar_lea.sflag (!%p1462_p1), [#allocation3], %s1347_s20  ;;  %s282_s17 = scalar_lea.vmem (!%p1462_p1), [#allocation2], %s1350_s4 }
  0x8d   : > { %1067 = dma.done.wait (%p1463_p8), %s279_s15, 128  }
  0x8e   : > { %1069 = vsyncadd (%p1463_p8), %s279_s15, 4294967168  ;;  %s287_s29 = sand.u32 1, %s1168_s25   ;;  %s291_s8 = scalar_lea.vmem [#allocation5], %s1350_s4 }
  0x8f   : > { %s288_s7 = scalar_lea.sflag [#allocation6], %s287_s29 }
  0x90   : > { %1071 = dma.done.wait (%p1463_p8), %s288_s7, 128  }
  0x91   : > { %1073 = vsyncadd (%p1463_p8), %s288_s7, 4294967168  ;;  %p1464_p11 = scmp.eq.s32.totalorder %s1168_s25, 0 }
  0x93   : > { %1075 = dma.done.wait (%p1464_p11), [#allocation6], 4096   ;;  %p1465_p0 = pmov %p1464_p11 }
  0x95   : > { %1077 = vsyncadd (%p1465_p0), [#allocation6], 4294963200  ;;  %p1466_p9 = pmov %p1465_p0 }
  0x96   : > { %p1467_p12 = pmov %p1465_p0 }
  0x97   : > { %1079 = dma.done.wait (%p1466_p9), [#allocation9], 2048  }
  0x98   : > { %1081 = vsyncadd (%p1467_p12), [#allocation9], 4294965248  ;;  %v1108_v0 = vmov 0.0|0.0   ;;  %v351_v1 = vld [vmem:[#allocation7 + $0x80] sm:$0xff]  ;;  %v352_v2 = vld [vmem:[#allocation7 + $0x88] sm:$0xff]  ;;  %vm1109_vm0 = vmmov 0  }
  0x99   : > { %805 = vmatprep.subr.bf16.mxu1 %v1108_v0  ;;  %v335_v3 = vld [vmem:[#allocation7] sm:$0xff]  ;;  %v773_v4 = vpack.c.bf16 %v352_v2, %v351_v1  ;;  %v336_v5 = vld [vmem:[#allocation7 + $0x8] sm:$0xff]  ;;  %v353_v6 = vld [vmem:[#allocation7 + $0x90] sm:$0xff]  ;;  %s683_s2 = sshll.u32 %s1168_s25, 7  ;;  %s332_s19 = scalar_lea.vmem [#allocation10], %s1350_s4 }
  0x9a   : > { %v354_v7 = vld [vmem:[#allocation7 + $0x98] sm:$0xff]  ;;  %v775_v8 = vpack.c.bf16 %v336_v5, %v335_v3  ;;  %v337_v10 = vld [vmem:[#allocation7 + $0x10] sm:$0xff]  ;;  %v355_v12 = vld [vmem:[#allocation7 + $0xa0] sm:$0xff]  ;;  %s553_s11 = sshll.u32 %s332_s19, 4  ;;  %s1395_s16 = scalar_lea.hbm %s1445_s6, %s683_s2  ;;  %s1397_s11 = int_to_ptr.vmem [resolvable:$true] %s553_s11 }
  0x9b   : > { %v777_v9 = vpack.c.bf16 %v354_v7, %v353_v6  ;;  %v338_v11 = vld [vmem:[#allocation7 + $0x18] sm:$0xff]  ;;  %774 = vmatprep.subr.bf16.mxu0 %v773_v4  ;;  %v356_v13 = vld [vmem:[#allocation7 + $0xa8] sm:$0xff]  ;;  %v339_v16 = vld [vmem:[#allocation7 + $0x20] sm:$0xff]  ;;  %s540_s30 = scalar_lea.sflag [#allocation4], %s1347_s20  ;;  %s1022_s15 = scalar_lea.vmem %s1397_s11, 128 }
  0x9c   : > { %776 = vmatpush3.bf16.msra.mxu0 %v775_v8  ;;  %v779_v14 = vpack.c.bf16 %v338_v11, %v337_v10  ;;  %v781_v15 = vpack.c.bf16 %v356_v13, %v355_v12  ;;  %v340_v17 = vld [vmem:[#allocation7 + $0x28] sm:$0xff]  ;;  %v357_v18 = vld [vmem:[#allocation7 + $0xb0] sm:$0xff]  ;;  %v358_v19 = vld [vmem:[#allocation7 + $0xb8] sm:$0xff]  ;;  %v1110_v12 = vmov 0.0   ;;  %p1023_p2 = scmp.ne.s32.totalorder %s1397_s11, %s1022_s15  ;;  %p1468_p13 = scmp.ne.s32.totalorder %s1459_s9, 0 }
  0x9d   : > { %778 = vmatprep.subr.bf16.mxu0 %v777_v9  ;;  %v783_v20 = vpack.c.bf16 %v340_v17, %v339_v16  ;;  %v785_v21 = vpack.c.bf16 %v358_v19, %v357_v18  ;;  %v341_v22 = vld [vmem:[#allocation7 + $0x30] sm:$0xff]  ;;  %v342_v23 = vld [vmem:[#allocation7 + $0x38] sm:$0xff]  ;;  %v359_v24 = vld [vmem:[#allocation7 + $0xc0] sm:$0xff]  ;;  %770 = vmatprep.mubr.msk.f32.mxu1 %vm1109_vm0, %v1110_v12  ;;  %s1111_s25 = smov [#allocation10]  }
  0x9e   : > { %v360_v25 = vld [vmem:[#allocation7 + $0xc8] sm:$0xff]  ;;  %v334_v26 = vld [vmem:[%s291_s8] sm:$0xff]  ;;  %v445_v27 = vld [vmem:[#allocation8] sm:$0xff]  ;;  %v787_v29 = vpack.c.bf16 %v342_v23, %v341_v22  ;;  %p1024_p6 = pnand %p1023_p2, %p1468_p13  ;;  %s1026_s4 = sshll.u32 %s1111_s25, 4  ;;  %s1027_s4 = int_to_ptr.vmem [resolvable:$false] %s1026_s4 }
  0x9f   : > { %438 = vmatprep.mubr.f32.mxu0 %v334_v26  ;;  %v446_v28 = vld [vmem:[#allocation8 + $0x8] sm:$0xff]  ;;  %v447_v31 = vld [vmem:[#allocation8 + $0x10] sm:$0xff]  ;;  %v448_v32 = vld [vmem:[#allocation8 + $0x18] sm:$0xff]  ;;  %v789_v33 = vpack.c.bf16 %v360_v25, %v359_v24  ;;  %p1029_p4 = scmp.lt.s32.totalorder %s1397_s11, %s1027_s4 }
  0xa0   : > { %780 = vmatpush3.bf16.msra.mxu0 %v779_v14  ;;  %v806_v30 = vpack.c.bf16 %v446_v28, %v445_v27  ;;  %v343_v34 = vld [vmem:[#allocation7 + $0x40] sm:$0xff]  ;;  %v344_v35 = vld [vmem:[#allocation7 + $0x48] sm:$0xff]  ;;  %v361_v36 = vld [vmem:[#allocation7 + $0xd0] sm:$0xff]  ;;  %v809_v38 = vpack.c.bf16 %v448_v32, %v447_v31  ;;  %p1025_p10 = pneg %p1024_p6 }
  0xa1   : > { %782 = vmatprep.subr.bf16.mxu0 %v781_v15  ;;  %v362_v37 = vld [vmem:[#allocation7 + $0xd8] sm:$0xff]  ;;  %v449_v39 = vld [vmem:[#allocation8 + $0x20] sm:$0xff]  ;;  %v450_v40 = vld [vmem:[#allocation8 + $0x28] sm:$0xff]  ;;  %v791_v41 = vpack.c.bf16 %v344_v35, %v343_v34 }
  0xa2   : > { %807 = vmatpush3.bf16.msra.mxu1 %v806_v30  ;;  %v793_v42 = vpack.c.bf16 %v362_v37, %v361_v36  ;;  %v345_v43 = vld [vmem:[#allocation7 + $0x50] sm:$0xff]  ;;  %v346_v44 = vld [vmem:[#allocation7 + $0x58] sm:$0xff]  ;;  %v363_v45 = vld [vmem:[#allocation7 + $0xe0] sm:$0xff]  ;;  %v812_v47 = vpack.c.bf16 %v450_v40, %v449_v39 }
  0xa3   : > { %808 = vmatprep.subr.bf16.mxu1 %v1108_v0  ;;  %v364_v46 = vld [vmem:[#allocation7 + $0xe8] sm:$0xff]  ;;  %v451_v48 = vld [vmem:[#allocation8 + $0x30] sm:$0xff]  ;;  %v452_v49 = vld [vmem:[#allocation8 + $0x38] sm:$0xff]  ;;  %v795_v50 = vpack.c.bf16 %v346_v44, %v345_v43 }
  0xa4   : > { %784 = vmatpush3.bf16.msra.mxu0 %v783_v20  ;;  %v797_v51 = vpack.c.bf16 %v364_v46, %v363_v45  ;;  %v347_v52 = vld [vmem:[#allocation7 + $0x60] sm:$0xff]  ;;  %v348_v53 = vld [vmem:[#allocation7 + $0x68] sm:$0xff]  ;;  %v365_v54 = vld [vmem:[#allocation7 + $0xf0] sm:$0xff]  ;;  %v815_v56 = vpack.c.bf16 %v452_v49, %v451_v48 }
  0xa5   : > { %786 = vmatprep.subr.bf16.mxu0 %v785_v21  ;;  %v366_v55 = vld [vmem:[#allocation7 + $0xf8] sm:$0xff]  ;;  %v453_v57 = vld [vmem:[#allocation8 + $0x40] sm:$0xff]  ;;  %v454_v58 = vld [vmem:[#allocation8 + $0x48] sm:$0xff]  ;;  %v799_v59 = vpack.c.bf16 %v348_v53, %v347_v52 }
  0xa6   : > { %810 = vmatpush3.bf16.msra.mxu1 %v809_v38  ;;  %v801_v60 = vpack.c.bf16 %v366_v55, %v365_v54  ;;  %v349_v61 = vld [vmem:[#allocation7 + $0x70] sm:$0xff]  ;;  %v350_v62 = vld [vmem:[#allocation7 + $0x78] sm:$0xff]  ;;  %v818_v63 = vpack.c.bf16 %v454_v58, %v453_v57  ;;  %v333_v5 = vld [vmem:[%s282_s17] sm:$0xff]  ;;  %s1028_s17 = scalar_lea.vmem %s1027_s4, 256 }
  0xa7   : > { %811 = vmatprep.subr.bf16.mxu1 %v1108_v0  ;;  %v455_v1 = vld [vmem:[#allocation8 + $0x50] sm:$0xff]  ;;  %v456_v2 = vld [vmem:[#allocation8 + $0x58] sm:$0xff]  ;;  %v803_v3 = vpack.c.bf16 %v350_v62, %v349_v61  ;;  %v457_v6 = vld [vmem:[#allocation8 + $0x60] sm:$0xff]  ;;  %p1030_p5 = scmp.lt.s32.totalorder %s1028_s17, %s1022_s15 }
  0xa8   : > { %788 = vmatpush3.bf16.msra.mxu0 %v787_v29  ;;  %v821_v4 = vpack.c.bf16 %v456_v2, %v455_v1  ;;  %v458_v7 = vld [vmem:[#allocation8 + $0x68] sm:$0xff]  ;;  %v459_v9 = vld [vmem:[#allocation8 + $0x70] sm:$0xff]  ;;  %v460_v10 = vld [vmem:[#allocation8 + $0x78] sm:$0xff] }
  0xa9   : > { %790 = vmatprep.subr.bf16.mxu0 %v789_v33  ;;  %v824_v8 = vpack.c.bf16 %v458_v7, %v457_v6  ;;  %v827_v11 = vpack.c.bf16 %v460_v10, %v459_v9  ;;  %v680_v14 = vld [vmem:[%s1442_s3] ss:$0 sm:$0xff]  ;;  %p1031_p3 = por %p1030_p5, %p1029_p4 }
  0xaa   : > { %813 = vmatpush3.bf16.msra.mxu1 %v812_v47  ;;  %v681_v18 = vld [vmem:[%s1444_s5] ss:$0 sm:$0xff] }
  0xab   : > { %814 = vmatprep.subr.bf16.mxu1 %v1108_v0  ;;  %p1032_p7 = pnand %p1031_p3, %p1025_p10 }
  0xac   : > { %792 = vmatpush3.bf16.msra.mxu0 %v791_v41 }
  0xad   : > { %794 = vmatprep.subr.bf16.mxu0 %v793_v42 }
  0xae   : > { %816 = vmatpush3.bf16.msra.mxu1 %v815_v56 }
  0xaf   : > { %817 = vmatprep.subr.bf16.mxu1 %v1108_v0 }
  0xb0   : > { %796 = vmatpush3.bf16.msra.mxu0 %v795_v50 }
  0xb1   : > { %798 = vmatprep.subr.bf16.mxu0 %v797_v51 }
  0xb2   : > { %819 = vmatpush3.bf16.msra.mxu1 %v818_v63 }
  0xb3   : > { %820 = vmatprep.subr.bf16.mxu1 %v1108_v0 }
  0xb4   : > { %800 = vmatpush3.bf16.msra.mxu0 %v799_v59 }
  0xb5   : > { %802 = vmatprep.subr.bf16.mxu0 %v801_v60 }
  0xb6   : > { %822 = vmatpush3.bf16.msra.mxu1 %v821_v4 }
  0xb7   : > { %823 = vmatprep.subr.bf16.mxu1 %v1108_v0 }
  0xb8   : > { %804 = vmatpush3.bf16.msra.mxu0 %v803_v3 }
  0xba   : > { %825 = vmatpush3.bf16.msra.mxu1 %v824_v8 }
  0xbb   : > { %439 = vmatmul.mubr.f32.vlgmr.msra.gmra.mrb[0].mxu0 %v333_v5  ;;  %826 = vmatprep.subr.bf16.mxu1 %v1108_v0 }
  0xbe   : > { %828 = vmatpush3.bf16.msra.mxu1 %v827_v11 }
 0x18e   : > { %v718_v13 = vpop.f32.mrb[0].mxu0 }
 0x18f   : > { %v719_v15 = vpop.f32.mrb[1].mxu0 }
 0x190   : > { %v720_v16 = vadd.f32 %v719_v15, %v718_v13 }
 0x192   : > { %v441_v17 = vadd.f32 %v720_v16, %v680_v14 }
 0x194   : > { %v444_v0 = vmax.f32 %v441_v17, 0.0 }
 0x196   : > { %771 = vmatmul.mubr.f32.vlgmr.msra.gmra.mrb[0].mxu1 %v444_v0 }
 0x269   : > { %v534_v19 = vpop.f32.mrb[0].mxu1 }
 0x26a   : > { %v535_v20 = vadd.f32 %v681_v18, %v534_v19  ;;  %v772_v21 = vpop.f32.mrb[1].mxu1 }
 0x26c   : > { %538 = vst [vmem:[%s332_s19] sm:$0xff] %v535_v20 }
 0x26d   : > { %1035 = shalt.err (!%p1032_p7)
}
 0x26e   : > { %s1036_s20 = scalar_lea.hbm %s1395_s16, 128  ;;  %s1040_s8 = scalar_lea.hbm %s1445_s6, 256 }
 0x26f   : > { %p1037_p1 = scmp.ne.s32.totalorder %s1395_s16, %s1036_s20  ;;  %p1041_p0 = scmp.lt.u32.totalorder %s1395_s16, %s1445_s6 }
 0x270   : > { %p1042_p9 = scmp.lt.u32.totalorder %s1040_s8, %s1036_s20  ;;  %p1044_p2 = scmp.lt.u32.totalorder %s1036_s20, %s1395_s16 }
 0x271   : > { %p1038_p8 = pnand %p1037_p1, %p1468_p13 }
 0x272   : > { %p1043_p12 = por %p1042_p9, %p1041_p0 }
 0x273   : > { %p1039_p11 = pneg %p1038_p8 }
 0x274   : > { %p1045_p6 = por %p1044_p2, %p1043_p12 }
 0x276   : > { %p1046_p10 = pnand %p1045_p6, %p1039_p11 }
 0x278   : > { %1049 = shalt.err (!%p1046_p10)
}
 0x279   : > { %841 = dma.vmem_to_hbm [thread:$0]  (%p1468_p13), %s1397_s11, 128, %s1395_s16, %s540_s30  }
 0x27a PF: > { %s565_s13 = sand.u32 1, %s1088_s21   ;;  %p1469_p4 = scmp.ne.s32.totalorder %s1453_s28, 0 }
 0x27b   : > { %p1470_p5 = scmp.ge.s32.totalorder %s1100_s24, 2  ;;  %s566_s12 = scalar_lea.sflag [#allocation4], %s565_s13 }
 0x27d   : > { %p858_p3 = pnand %p1470_p5, %p1469_p4 }
 0x27f   : > { %1083 = dma.done.wait (!%p858_p3), %s566_s12, 128  }
 0x280   : > { %1085 = vsyncadd (!%p858_p3), %s566_s12, 4294967168  ;;  %s1471_s2 = sld [smem:[#allocation16_spill]]  ;;  %p23_p7 = scmp.ge.s32.totalorder %s1257_s26, 4  }
 0x281   : > { %s1472_s21 = smov %s1092_s22  ;;  %s1473_s22 = smov %s1096_s23 }
 0x282   : > { %s1475_s24 = smov %s1257_s26  ;;  %25 = sbr.rel (!%p23_p7) target bundleno = 11 (0xb), region = 110 }
 0x286   : > { %s1474_s23 = smov %s1471_s2 }
 0x289   :  { %571 = vsyncpa [#allocation3], 1 }
 0x28a   :  { %573 = vsyncpa [#allocation3 + $0x1], 1 }
 0x28b   :  { %574 = vsyncpa [#allocation6], 1 }
 0x28c   :  { %576 = vsyncpa [#allocation6 + $0x1], 1 }
 0x28d   :  { %577 = vsyncpa [#allocation9], 1 }
 0x28e   :  { %578 = vsyncpa [#allocation4], 1 }
 0x28f   :  { %580 = vsyncpa [#allocation4 + $0x1], 1 }

</bundles_post_ra>
